<compile_context>
chip_gen: v5e
topology: v5e:2x2
jax: 0.10.0
libtpu: 0.0.40
codegen_flags: <defaults>
</compile_context>

<pallas_src>
import functools

import jax
import jax.numpy as jnp
from jax.experimental import pallas as pl
from jax.experimental.pallas import tpu as pltpu

H1, H2, H3 = 128, 64, 1


def _round_up(n, m):
    return ((n + m - 1) // m) * m


def ffnn_kernel(x_ref, w1_ref, b1_ref, w2_ref, b2_ref, w3_ref, b3_ref, o_ref):
    # Layer 1: (H1, D) @ (D, TB) -> (H1, TB); bf16 MXU inputs, f32 accumulation, +bias, ReLU.
    h1 = jnp.dot(w1_ref[...], x_ref[...], preferred_element_type=jnp.float32)
    h1 = jnp.maximum(h1 + b1_ref[...], 0.0)
    # Layer 2: (H2, H1) @ (H1, TB) -> (H2, TB).
    h2 = jnp.dot(w2_ref[...], h1.astype(jnp.bfloat16),
                 preferred_element_type=jnp.float32)
    h2 = jnp.maximum(h2 + b2_ref[...], 0.0)
    # Layer 3 (output width 1): VPU broadcast-multiply + sublane reduction instead of a
    # degenerate M=1 MXU pass; the bias arrives as an SMEM scalar.
    h3 = jnp.sum(h2 * w3_ref[...], axis=0, keepdims=True) + b3_ref[0]      # (1, TB)
    # Sigmoid via EUP exp + approximate reciprocal (EUP slot is otherwise idle here).
    o_ref[...] = pl.reciprocal(1.0 + jnp.exp(-h3), approx=True).astype(o_ref.dtype)


@functools.partial(jax.jit, static_argnames=("tb",))
def feedforward_nn(x, w1, b1, w2, b2, w3, b3, *, tb=512):
    """x: (B, D). Weights in PyTorch (out, in) orientation; w3 pre-transposed to (H2, 1)."""
    B, D = x.shape
    # Batch tile lives on the lane axis: multiple of 128.  Big tiles amortize the ~0.35us
    # per-step overhead, but don't over-pad tiny batches.
    tb = min(tb, _round_up(max(B, 1), 128))
    bp = _round_up(B, tb)

    # Feature-major + bf16 for the MXU; pad the ragged batch tail so DMAs stay rectangular.
    x_t = jnp.zeros((D, bp), jnp.bfloat16).at[:, :B].set(x.T.astype(jnp.bfloat16))

    out = pl.pallas_call(
        ffnn_kernel,
        out_shape=jax.ShapeDtypeStruct((1, bp), jnp.float32),
        grid=(bp // tb,),
        in_specs=[
            pl.BlockSpec((D, tb), lambda i: (0, i)),        # x tile: streamed, double-buffered
            pl.BlockSpec((H1, D), lambda i: (0, 0)),        # weights/biases: constant index_map
            pl.BlockSpec((H1, 1), lambda i: (0, 0)),        #   -> resident in VMEM across steps
            pl.BlockSpec((H2, H1), lambda i: (0, 0)),
            pl.BlockSpec((H2, 1), lambda i: (0, 0)),
            pl.BlockSpec((H2, 1), lambda i: (0, 0)),
            pl.BlockSpec(memory_space=pltpu.MemorySpace.SMEM),  # b3 scalar in SMEM
        ],
        out_specs=pl.BlockSpec((1, tb), lambda i: (0, i)),  # lane-dense output slab
        compiler_params=pltpu.CompilerParams(
            dimension_semantics=("parallel",),              # shard batch across TCs on v7x
            vmem_limit_bytes=32 * 1024 * 1024,              # explicit; safe on v7x's 64 MiB VMEM
        ),
    )(x_t, w1, b1, w2, b2, w3, b3)

    return out[:, :B].T  # back to (B, 1), matching the PyTorch module's output


def init_params(key, input_dim):
    # PyTorch nn.Linear default init: uniform(+/- 1/sqrt(fan_in)); weights stored (out, in).
    ks = jax.random.split(key, 6)

    def lin(kw, kb, fan_in, fan_out, w_dtype):
        bound = 1.0 / jnp.sqrt(fan_in)
        w = jax.random.uniform(kw, (fan_out, fan_in), jnp.float32, -bound, bound)
        b = jax.random.uniform(kb, (fan_out, 1), jnp.float32, -bound, bound)
        return w.astype(w_dtype), b

    w1, b1 = lin(ks[0], ks[1], input_dim, H1, jnp.bfloat16)  # MXU weights stored bf16
    w2, b2 = lin(ks[2], ks[3], H1, H2, jnp.bfloat16)
    w3, b3 = lin(ks[4], ks[5], H2, H3, jnp.float32)          # layer 3 runs on VPU; keep f32
    w3 = w3.T                 # (H2, 1) column for the broadcast-multiply
    b3 = b3.reshape((1,))     # SMEM scalar
    return w1, b1, w2, b2, w3, b3


if __name__ == "__main__":
    key = jax.random.PRNGKey(0)
    k_x, k_p = jax.random.split(key)

    batch = 8
    input_dim = 32
    x = jax.random.normal(k_x, (batch, input_dim), jnp.float32)
    params = init_params(k_p, input_dim)

    out = feedforward_nn(x, *params)
    out = jax.block_until_ready(out)
    assert out.shape == (batch, 1)

    # Reference in plain JAX (apply the same bf16 rounding of MXU inputs as the kernel).
    w1, b1, w2, b2, w3, b3 = params
    xb = x.astype(jnp.bfloat16).astype(jnp.float32)
    w1f = w1.astype(jnp.float32)
    w2f = w2.astype(jnp.float32)
    h = jnp.maximum(xb @ w1f.T + b1.T, 0.0)
    h = jnp.maximum(h.astype(jnp.bfloat16).astype(jnp.float32) @ w2f.T + b2.T, 0.0)
    ref = jax.nn.sigmoid(h @ w3 + b3)                        # (B, 1)
    assert jnp.allclose(out, ref, atol=5e-3), "mismatch vs reference"

    print("KERNEL_OK")
</pallas_src>

<mosaic_0001>
module attributes {stable_mosaic.version = 11 : i64} {
  func.func @ffnn_kernel(%arg0: i32, %arg1: memref<32x128xbf16, #tpu.memory_space<vmem>>, %arg2: memref<128x32xbf16, #tpu.memory_space<vmem>>, %arg3: memref<128x1xf32, #tpu.memory_space<vmem>>, %arg4: memref<64x128xbf16, #tpu.memory_space<vmem>>, %arg5: memref<64x1xf32, #tpu.memory_space<vmem>>, %arg6: memref<64x1xf32, #tpu.memory_space<vmem>>, %arg7: memref<1xf32, #tpu.memory_space<smem>>, %arg8: memref<1x128xf32, #tpu.memory_space<vmem>>) attributes {dimension_semantics = [#tpu.dimension_semantics<parallel>], iteration_bounds = array<i64: 1>, scalar_prefetch = 0 : i64, scratch_operands = 0 : i64, tpu.core_type = #tpu.core_type<tc>, window_params = [{transform_indices = @transform_0, window_bounds = array<i64: 32, 128>}, {pipeline_mode = #tpu.pipeline_mode<synchronous>, transform_indices = @transform_1, window_bounds = array<i64: 128, 32>}, {pipeline_mode = #tpu.pipeline_mode<synchronous>, transform_indices = @transform_2, window_bounds = array<i64: 128, 1>}, {pipeline_mode = #tpu.pipeline_mode<synchronous>, transform_indices = @transform_3, window_bounds = array<i64: 64, 128>}, {pipeline_mode = #tpu.pipeline_mode<synchronous>, transform_indices = @transform_4, window_bounds = array<i64: 64, 1>}, {pipeline_mode = #tpu.pipeline_mode<synchronous>, transform_indices = @transform_5, window_bounds = array<i64: 64, 1>}, {transform_indices = @transform_6, window_bounds = array<i64: 1>}, {transform_indices = @transform_7, window_bounds = array<i64: 1, 128>}]} {
    %c0 = arith.constant 0 : index
    %c0_0 = arith.constant 0 : index
    %0 = vector.load %arg2[%c0, %c0_0] : memref<128x32xbf16, #tpu.memory_space<vmem>>, vector<128x32xbf16>
    %c0_1 = arith.constant 0 : index
    %c0_2 = arith.constant 0 : index
    %1 = vector.load %arg1[%c0_1, %c0_2] : memref<32x128xbf16, #tpu.memory_space<vmem>>, vector<32x128xbf16>
    %cst = arith.constant dense<0.000000e+00> : vector<128x128xf32>
    %2 = tpu.matmul %0, %1, %cst {dimension_numbers = #tpu.dot_dimension_numbers<[1], [0], [0], [1], [0, 0, 1, 1], [], []>} : vector<128x32xbf16>, vector<32x128xbf16>, vector<128x128xf32> -> vector<128x128xf32>
    %c0_3 = arith.constant 0 : index
    %c0_4 = arith.constant 0 : index
    %3 = vector.load %arg3[%c0_3, %c0_4] : memref<128x1xf32, #tpu.memory_space<vmem>>, vector<128x1xf32>
    %4 = vector.broadcast %3 : vector<128x1xf32> to vector<128x128xf32>
    %5 = arith.addf %2, %4 : vector<128x128xf32>
    %cst_5 = arith.constant 0.000000e+00 : f32
    %6 = vector.broadcast %cst_5 : f32 to vector<128x128xf32>
    %7 = arith.maximumf %5, %6 : vector<128x128xf32>
    %c0_6 = arith.constant 0 : index
    %c0_7 = arith.constant 0 : index
    %8 = vector.load %arg4[%c0_6, %c0_7] : memref<64x128xbf16, #tpu.memory_space<vmem>>, vector<64x128xbf16>
    %9 = arith.truncf %7 : vector<128x128xf32> to vector<128x128xbf16>
    %cst_8 = arith.constant dense<0.000000e+00> : vector<64x128xf32>
    %10 = tpu.matmul %8, %9, %cst_8 {dimension_numbers = #tpu.dot_dimension_numbers<[1], [0], [0], [1], [0, 0, 1, 1], [], []>} : vector<64x128xbf16>, vector<128x128xbf16>, vector<64x128xf32> -> vector<64x128xf32>
    %c0_9 = arith.constant 0 : index
    %c0_10 = arith.constant 0 : index
    %11 = vector.load %arg5[%c0_9, %c0_10] : memref<64x1xf32, #tpu.memory_space<vmem>>, vector<64x1xf32>
    %12 = vector.broadcast %11 : vector<64x1xf32> to vector<64x128xf32>
    %13 = arith.addf %10, %12 : vector<64x128xf32>
    %cst_11 = arith.constant 0.000000e+00 : f32
    %14 = vector.broadcast %cst_11 : f32 to vector<64x128xf32>
    %15 = arith.maximumf %13, %14 : vector<64x128xf32>
    %c0_12 = arith.constant 0 : index
    %c0_13 = arith.constant 0 : index
    %16 = vector.load %arg6[%c0_12, %c0_13] : memref<64x1xf32, #tpu.memory_space<vmem>>, vector<64x1xf32>
    %17 = vector.broadcast %16 : vector<64x1xf32> to vector<64x128xf32>
    %18 = arith.mulf %15, %17 : vector<64x128xf32>
    %cst_14 = arith.constant dense<0.000000e+00> : vector<128xf32>
    %19 = vector.multi_reduction <add>, %18, %cst_14 [0] : vector<64x128xf32> to vector<128xf32>
    %20 = vector.shape_cast %19 : vector<128xf32> to vector<1x128xf32>
    %c0_15 = arith.constant 0 : index
    %21 = memref.load %arg7[%c0_15] : memref<1xf32, #tpu.memory_space<smem>>
    %22 = vector.broadcast %21 : f32 to vector<1x128xf32>
    %23 = arith.addf %20, %22 : vector<1x128xf32>
    %cst_16 = arith.constant 0.000000e+00 : f32
    %24 = vector.broadcast %cst_16 : f32 to vector<1x128xf32>
    %25 = arith.subf %24, %23 : vector<1x128xf32>
    %26 = math.exp %25 : vector<1x128xf32>
    %cst_17 = arith.constant 1.000000e+00 : f32
    %27 = vector.broadcast %cst_17 : f32 to vector<1x128xf32>
    %28 = arith.addf %27, %26 : vector<1x128xf32>
    %29 = tpu.reciprocal %28 {approx = true} : vector<1x128xf32> -> vector<1x128xf32>
    %c0_18 = arith.constant 0 : index
    %c0_19 = arith.constant 0 : index
    %30 = vector.load %arg8[%c0_18, %c0_19] : memref<1x128xf32, #tpu.memory_space<vmem>>, vector<1x128xf32>
    tpu.vector_store %arg8[%c0_18, %c0_19], %29 {strides = array<i32>} : memref<1x128xf32, #tpu.memory_space<vmem>>, vector<1x128xf32>,
    return
  }
  func.func @transform_0(%arg0: i32) -> (i32, i32) {
    %c0_i32 = arith.constant 0 : i32
    %c0_i32_0 = arith.constant 0 : i32
    return %c0_i32, %arg0 : i32, i32
  }
  func.func @transform_1(%arg0: i32) -> (i32, i32) {
    %c0_i32 = arith.constant 0 : i32
    %c0_i32_0 = arith.constant 0 : i32
    %c0_i32_1 = arith.constant 0 : i32
    return %c0_i32, %c0_i32_0 : i32, i32
  }
  func.func @transform_2(%arg0: i32) -> (i32, i32) {
    %c0_i32 = arith.constant 0 : i32
    %c0_i32_0 = arith.constant 0 : i32
    %c0_i32_1 = arith.constant 0 : i32
    return %c0_i32, %c0_i32_0 : i32, i32
  }
  func.func @transform_3(%arg0: i32) -> (i32, i32) {
    %c0_i32 = arith.constant 0 : i32
    %c0_i32_0 = arith.constant 0 : i32
    %c0_i32_1 = arith.constant 0 : i32
    return %c0_i32, %c0_i32_0 : i32, i32
  }
  func.func @transform_4(%arg0: i32) -> (i32, i32) {
    %c0_i32 = arith.constant 0 : i32
    %c0_i32_0 = arith.constant 0 : i32
    %c0_i32_1 = arith.constant 0 : i32
    return %c0_i32, %c0_i32_0 : i32, i32
  }
  func.func @transform_5(%arg0: i32) -> (i32, i32) {
    %c0_i32 = arith.constant 0 : i32
    %c0_i32_0 = arith.constant 0 : i32
    %c0_i32_1 = arith.constant 0 : i32
    return %c0_i32, %c0_i32_0 : i32, i32
  }
  func.func @transform_6(%arg0: i32) -> i32 {
    %c0_i32 = arith.constant 0 : i32
    %c0_i32_0 = arith.constant 0 : i32
    return %c0_i32 : i32
  }
  func.func @transform_7(%arg0: i32) -> (i32, i32) {
    %c0_i32 = arith.constant 0 : i32
    %c0_i32_0 = arith.constant 0 : i32
    return %c0_i32, %arg0 : i32, i32
  }
}

</mosaic_0001>

<bundles_post_ra>
// kernel: feedforward_nn.1
= control target key start
LH: loop header
LB: loop body
LE: loop exit
PB: predicated region body
PF: predicated region fallthrough
CT: control target
= control target key end

     0   :  { %v589_v0 = vmov 0   ;;  %vm196_vm0 = vcmask 261120   ;;  %s788_s2 = inlined_call_operand.vmem [shape: f32[128,1], index: 2, kind: input, shape index: {}]   ;;  %s789_s0 = inlined_call_operand.vmem [shape: bf16[32,128], index: 0, kind: input, shape index: {}]   ;;  %s790_s1 = inlined_call_operand.vmem [shape: bf16[128,32], index: 1, kind: input, shape index: {}]   ;;  %s791_s4 = inlined_call_operand.vmem [shape: f32[64,1], index: 4, kind: input, shape index: {}]   ;;  %s792_s5 = inlined_call_operand.vmem [shape: f32[64,1], index: 5, kind: input, shape index: {}]   ;;  %s793_s3 = inlined_call_operand.vmem [shape: bf16[64,128], index: 3, kind: input, shape index: {}]   ;;  %s794_s6 = inlined_call_operand.<no memory space> [shape: f32[1], index: 6, kind: input, shape index: {}]   ;;  %s795_s7 = inlined_call_operand.vmem [shape: f32[1,128], index: 7, kind: output, shape index: {}]  }
   0x1   :  { %583 = vset.pattern.permute.xlu1 %v589_v0  ;;  %582 = vset.pattern.permute.xlu0 %v589_v0  ;;  %v62_v1 = vld [vmem:[%s788_s2 + $0x70] sm:$0xff]  ;;  %v60_v2 = vld [vmem:[%s788_s2 + $0x60] sm:$0xff]  ;;  %v566_v3 = vld [vmem:[%s789_s0 + $0x8] sm:$0xff] }
   0x2   :  { %136 = vperm.xlu0 %582, %v62_v1   ;;  %126 = vperm.xlu1 %583, %v60_v2   ;;  %v565_v4 = vld [vmem:[%s789_s0] sm:$0xff]  ;;  %v58_v5 = vld [vmem:[%s788_s2 + $0x50] sm:$0xff]  ;;  %v63_v6 = vld [vmem:[%s788_s2 + $0x78] sm:$0xff] }
   0x3   :  { %227 = vmatpush.bf16.msra.mxu0 %v566_v3  ;;  %571 = vmatpush.bf16.msra.mxu2 %v566_v3  ;;  %v61_v7 = vld [vmem:[%s788_s2 + $0x68] sm:$0xff]  ;;  %v557_v8 = vld [vmem:[%s790_s1] sm:$0xff]  ;;  %v59_v10 = vld [vmem:[%s788_s2 + $0x58] sm:$0xff] }
   0x4   :  { %584 = vset.pattern.permute.xlu2 %v589_v0  ;;  %v561_v9 = vld [vmem:[%s790_s1 + $0x20] sm:$0xff]  ;;  %v57_v11 = vld [vmem:[%s788_s2 + $0x48] sm:$0xff]  ;;  %v54_v13 = vld [vmem:[%s788_s2 + $0x30] sm:$0xff] }
   0x5   :  { %116 = vperm.xlu2 %584, %v58_v5   ;;  %v56_v12 = vld [vmem:[%s788_s2 + $0x40] sm:$0xff]  ;;  %v55_v14 = vld [vmem:[%s788_s2 + $0x38] sm:$0xff]  ;;  %v558_v16 = vld [vmem:[%s790_s1 + $0x8] sm:$0xff] }
   0x6   :  { %v52_v15 = vld [vmem:[%s788_s2 + $0x20] sm:$0xff]  ;;  %v562_v17 = vld [vmem:[%s790_s1 + $0x28] sm:$0xff]  ;;  %v51_v19 = vld [vmem:[%s788_s2 + $0x18] sm:$0xff] }
   0x7   :  { %228 = vmatpush.bf16.msra.mxu0 %v565_v4  ;;  %572 = vmatpush.bf16.msra.mxu2 %v565_v4  ;;  %v53_v18 = vld [vmem:[%s788_s2 + $0x28] sm:$0xff]  ;;  %v50_v20 = vld [vmem:[%s788_s2 + $0x10] sm:$0xff]  ;;  %v48_v21 = vld [vmem:[%s788_s2] sm:$0xff] }
   0x8   :  { %v302_v22 = vld [vmem:[%s791_s4] sm:$0xff]  ;;  %v49_v23 = vld [vmem:[%s788_s2 + $0x8] sm:$0xff]  ;;  %v559_v24 = vld [vmem:[%s790_s1 + $0x10] sm:$0xff] }
   0x9   :  { %v563_v25 = vld [vmem:[%s790_s1 + $0x30] sm:$0xff]  ;;  %v303_v26 = vld [vmem:[%s791_s4 + $0x8] sm:$0xff]  ;;  %v305_v27 = vld [vmem:[%s791_s4 + $0x18] sm:$0xff] }
   0xa   :  { %141 = vperm.xlu0 %582, %v63_v6   ;;  %131 = vperm.xlu1 %583, %v61_v7   ;;  %v304_v28 = vld [vmem:[%s791_s4 + $0x10] sm:$0xff]  ;;  %v411_v29 = vld [vmem:[%s792_s5] sm:$0xff]  ;;  %v412_v31 = vld [vmem:[%s792_s5 + $0x8] sm:$0xff] }
   0xb   :  { %533 = vmatmul.msk.bf16.vlgmr.msra.gmra.mxu0 %vm196_vm0, %v557_v8  ;;  %537 = vmatmul.msk.bf16.vlgmr.msra.gmra.mxu2 %vm196_vm0, %v561_v9  ;;  %v306_v30 = vld [vmem:[%s791_s4 + $0x20] sm:$0xff]  ;;  %v560_v32 = vld [vmem:[%s790_s1 + $0x18] sm:$0xff]  ;;  %v413_v34 = vld [vmem:[%s792_s5 + $0x10] sm:$0xff] }
   0xc   :  { %v564_v33 = vld [vmem:[%s790_s1 + $0x38] sm:$0xff]  ;;  %v307_v36 = vld [vmem:[%s791_s4 + $0x28] sm:$0xff]  ;;  %v308_v37 = vld [vmem:[%s791_s4 + $0x30] sm:$0xff] }
   0xd   :  { %121 = vperm.xlu2 %584, %v59_v10   ;;  %v414_v35 = vld [vmem:[%s792_s5 + $0x18] sm:$0xff]  ;;  %v415_v39 = vld [vmem:[%s792_s5 + $0x20] sm:$0xff]  ;;  %v416_v40 = vld [vmem:[%s792_s5 + $0x28] sm:$0xff] }
   0xe   :  { %v309_v38 = vld [vmem:[%s791_s4 + $0x38] sm:$0xff]  ;;  %v417_v42 = vld [vmem:[%s792_s5 + $0x30] sm:$0xff] }
   0xf   :  { %v418_v41 = vld [vmem:[%s792_s5 + $0x38] sm:$0xff] }
  0x12   :  { %111 = vperm.xlu1 %583, %v57_v11   ;;  %106 = vperm.xlu0 %582, %v56_v12  }
  0x15   :  { %96 = vperm.xlu2 %584, %v54_v13  }
  0x1a   :  { %101 = vperm.xlu0 %582, %v55_v14   ;;  %86 = vperm.xlu1 %583, %v52_v15  }
  0x1b   :  { %534 = vmatmul.msk.bf16.gmra.mxu0 %vm196_vm0, %v558_v16  ;;  %538 = vmatmul.msk.bf16.gmra.mxu2 %vm196_vm0, %v562_v17 }
  0x1d   :  { %91 = vperm.xlu2 %584, %v53_v18  }
  0x22   :  { %81 = vperm.xlu1 %583, %v51_v19   ;;  %76 = vperm.xlu0 %582, %v50_v20  }
  0x25   :  { %66 = vperm.xlu2 %584, %v48_v21  }
  0x2a   :  { %312 = vperm.xlu1 %583, %v302_v22   ;;  %71 = vperm.xlu0 %582, %v49_v23  }
  0x2b   :  { %535 = vmatmul.msk.bf16.gmra.mxu0 %vm196_vm0, %v559_v24  ;;  %539 = vmatmul.msk.bf16.gmra.mxu2 %vm196_vm0, %v563_v25 }
  0x2d   :  { %317 = vperm.xlu2 %584, %v303_v26  }
  0x32   :  { %327 = vperm.xlu1 %583, %v305_v27   ;;  %322 = vperm.xlu0 %582, %v304_v28  }
  0x35   :  { %421 = vperm.xlu2 %584, %v411_v29  }
  0x3a   :  { %332 = vperm.xlu1 %583, %v306_v30   ;;  %426 = vperm.xlu0 %582, %v412_v31  }
  0x3b   :  { %536 = vmatmul.msk.bf16.gmra.mxu0 %vm196_vm0, %v560_v32  ;;  %540 = vmatmul.msk.bf16.gmra.mxu2 %vm196_vm0, %v564_v33 }
  0x3d   :  { %431 = vperm.xlu2 %584, %v413_v34  }
  0x42   :  { %436 = vperm.xlu1 %583, %v414_v35   ;;  %337 = vperm.xlu0 %582, %v307_v36  }
  0x45   :  { %342 = vperm.xlu2 %584, %v308_v37  }
  0x4a   :  { %347 = vperm.xlu1 %583, %v309_v38   ;;  %441 = vperm.xlu0 %582, %v415_v39  }
  0x4d   :  { %446 = vperm.xlu2 %584, %v416_v40  }
  0x52   :  { %456 = vperm.xlu1 %583, %v418_v41   ;;  %451 = vperm.xlu0 %582, %v417_v42  }
  0x5f   :  { %v117_v56 = vpop.permute.xlu2 %116 }
  0x67   :  { %v122_v62 = vpop.permute.xlu2 %121 }
  0x6f   :  { %v97_v6 = vpop.permute.xlu2 %96 }
  0x74   :  { %v137_v51 = vpop.permute.xlu0 %136  ;;  %v127_v53 = vpop.permute.xlu1 %126 }
  0x77   :  { %v92_v24 = vpop.permute.xlu2 %91 }
  0x7c   :  { %v142_v55 = vpop.permute.xlu0 %141  ;;  %v132_v58 = vpop.permute.xlu1 %131 }
  0x7f   :  { %v67_v41 = vpop.permute.xlu2 %66 }
  0x84   :  { %v107_v60 = vpop.permute.xlu0 %106  ;;  %v112_v63 = vpop.permute.xlu1 %111 }
  0x88   :  { %v764_v43 = vpop.f32.mrf.mxu0 }
  0x89   :  { %v231_v42 = vadd.f32 %v764_v43, %v67_v41  ;;  %v568_v43 = vld [vmem:[%s793_s3 + $0x8] sm:$0xff] }
  0x8c   :  { %v102_v5 = vpop.permute.xlu0 %101  ;;  %v87_v18 = vpop.permute.xlu1 %86 }
  0x8e   :  { %v250_v44 = vpop.f32.mrf.mxu2 }
  0x8f   :  { %v251_v19 = vadd.f32 %v250_v44, %v107_v60 }
  0x90   :  { %v766_v45 = vpop.f32.mrf.mxu0 }
  0x91   :  { %v278_v28 = vmax.f32 %v251_v19, 0.0 }
  0x94   :  { %v77_v22 = vpop.permute.xlu0 %76  ;;  %v82_v34 = vpop.permute.xlu1 %81 }
  0x96   :  { %v252_v46 = vpop.f32.mrf.mxu2 }
  0x97   :  { %v253_v15 = vadd.f32 %v252_v46, %v112_v63 }
  0x98   :  { %v235_v47 = vpop.f32.mrf.mxu0 }
  0x99   :  { %v279_v23 = vmax.f32 %v253_v15, 0.0  ;;  %v236_v35 = vadd.f32 %v235_v47, %v77_v22 }
  0x9b   :  { %v298_v29 = vpack.c.bf16 %v279_v23, %v278_v28  ;;  %v272_v44 = vmax.f32 %v236_v35, 0.0 }
  0x9c   :  { %v72_v40 = vpop.permute.xlu0 %71 }
  0x9d   :  { %v233_v46 = vadd.f32 %v766_v45, %v72_v40  ;;  %v569_v45 = vld [vmem:[%s793_s3 + $0x10] sm:$0xff] }
  0x9e   :  { %v255_v48 = vpop.f32.mrf.mxu2 }
  0x9f   :  { %v256_v13 = vadd.f32 %v255_v48, %v117_v56  ;;  %v318_v56 = vpop.permute.xlu2 %317 }
  0xa0   :  { %v237_v50 = vpop.f32.mrf.mxu0 }
  0xa1   :  { %v280_v21 = vmax.f32 %v256_v13, 0.0  ;;  %v238_v36 = vadd.f32 %v237_v50, %v82_v34 }
  0xa3   :  { %v273_v48 = vmax.f32 %v238_v36, 0.0 }
  0xa5   :  { %v295_v47 = vpack.c.bf16 %v273_v48, %v272_v44 }
  0xa6   :  { %v257_v49 = vpop.f32.mrf.mxu2 }
  0xa7   :  { %v258_v10 = vadd.f32 %v257_v49, %v122_v62  ;;  %v422_v60 = vpop.permute.xlu2 %421 }
  0xa8   :  { %v240_v54 = vpop.f32.mrf.mxu0 }
  0xa9   :  { %v281_v16 = vmax.f32 %v258_v10, 0.0  ;;  %v241_v30 = vadd.f32 %v240_v54, %v87_v18  ;;  %v570_v54 = vld [vmem:[%s793_s3 + $0x18] sm:$0xff] }
  0xab   :  { %v299_v27 = vpack.c.bf16 %v281_v16, %v280_v21  ;;  %v274_v37 = vmax.f32 %v241_v30, 0.0 }
  0xae   :  { %v260_v52 = vpop.f32.mrf.mxu2 }
  0xaf   :  { %v261_v7 = vadd.f32 %v260_v52, %v127_v53  ;;  %v271_v52 = vmax.f32 %v233_v46, 0.0  ;;  %v567_v53 = vld [vmem:[%s793_s3] sm:$0xff] }
  0xb0   :  { %v242_v59 = vpop.f32.mrf.mxu0 }
  0xb1   :  { %v282_v14 = vmax.f32 %v261_v7, 0.0  ;;  %v243_v31 = vadd.f32 %v242_v59, %v92_v24 }
  0xb3   :  { %v275_v38 = vmax.f32 %v243_v31, 0.0 }
  0xb5   :  { %v296_v49 = vpack.c.bf16 %v275_v38, %v274_v37 }
  0xb6   :  { %v262_v57 = vpop.f32.mrf.mxu2 }
  0xb7   :  { %v263_v3 = vadd.f32 %v262_v57, %v132_v58  ;;  %v323_v57 = vpop.permute.xlu0 %322 }
  0xb8   :  { %v245_v1 = vpop.f32.mrf.mxu0 }
  0xb9   :  { %v283_v11 = vmax.f32 %v263_v3, 0.0  ;;  %v246_v25 = vadd.f32 %v245_v1, %v97_v6 }
  0xbb   :  { %v300_v17 = vpack.c.bf16 %v283_v11, %v282_v14  ;;  %v276_v32 = vmax.f32 %v246_v25, 0.0 }
  0xbe   :  { %v265_v61 = vpop.f32.mrf.mxu2 }
  0xbf   :  { %v266_v0 = vadd.f32 %v265_v61, %v137_v51  ;;  %v270_v51 = vmax.f32 %v231_v42, 0.0  ;;  %v427_v63 = vpop.permute.xlu0 %426 }
  0xc0   :  { %v247_v20 = vpop.f32.mrf.mxu0 }
  0xc1   :  { %v284_v8 = vmax.f32 %v266_v0, 0.0  ;;  %v248_v26 = vadd.f32 %v247_v20, %v102_v5  ;;  %v294_v50 = vpack.c.bf16 %v271_v52, %v270_v51 }
  0xc3   :  { %v277_v33 = vmax.f32 %v248_v26, 0.0 }
  0xc5   :  { %v297_v39 = vpack.c.bf16 %v277_v33, %v276_v32 }
  0xc6   :  { %v267_v2 = vpop.f32.mrf.mxu2 }
  0xc7   :  { %v268_v4 = vadd.f32 %v267_v2, %v142_v55  ;;  %v313_v55 = vpop.permute.xlu1 %312  ;;  %v432_v2 = vpop.permute.xlu2 %431 }
  0xc9   :  { %v285_v9 = vmax.f32 %v268_v4, 0.0  ;;  %v338_v4 = vpop.permute.xlu0 %337 }
  0xcb   :  { %v301_v12 = vpack.c.bf16 %v285_v9, %v284_v8 }
  0xcd   :  { %374 = vmatpush.bf16.msra.mxu1 %v301_v12  ;;  %573 = vmatpush.bf16.msra.mxu3 %v301_v12 }
  0xcf   :  { %v328_v59 = vpop.permute.xlu1 %327  ;;  %v343_v13 = vpop.permute.xlu2 %342 }
  0xd1   :  { %375 = vmatpush.bf16.msra.mxu1 %v300_v17  ;;  %574 = vmatpush.bf16.msra.mxu3 %v300_v17  ;;  %v442_v16 = vpop.permute.xlu0 %441 }
  0xd5   :  { %376 = vmatpush.bf16.msra.mxu1 %v299_v27  ;;  %575 = vmatpush.bf16.msra.mxu3 %v299_v27 }
  0xd7   :  { %v333_v0 = vpop.permute.xlu1 %332  ;;  %v447_v32 = vpop.permute.xlu2 %446 }
  0xd9   :  { %377 = vmatpush.bf16.msra.mxu1 %v298_v29  ;;  %576 = vmatpush.bf16.msra.mxu3 %v298_v29  ;;  %v452_v35 = vpop.permute.xlu0 %451 }
  0xdd   :  { %378 = vmatpush.bf16.msra.mxu1 %v297_v39  ;;  %577 = vmatpush.bf16.msra.mxu3 %v297_v39 }
  0xdf   :  { %v437_v7 = vpop.permute.xlu1 %436 }
  0xe1   :  { %379 = vmatpush.bf16.msra.mxu1 %v296_v49  ;;  %578 = vmatpush.bf16.msra.mxu3 %v296_v49 }
  0xe5   :  { %380 = vmatpush.bf16.msra.mxu1 %v295_v47  ;;  %579 = vmatpush.bf16.msra.mxu3 %v295_v47 }
  0xe7   :  { %v348_v25 = vpop.permute.xlu1 %347 }
  0xe9   :  { %381 = vmatpush.bf16.msra.mxu1 %v294_v50  ;;  %580 = vmatpush.bf16.msra.mxu3 %v294_v50 }
  0xec   :  { %382 = vmatmul.bf16.vlgmr.msra.gmra.mxu1 %v567_v53  ;;  %387 = vmatmul.bf16.vlgmr.msra.gmra.mxu3 %v568_v43  ;;  %v481_v53 = vstv %s794_s6 }
  0xef   :  { %v457_v42 = vpop.permute.xlu1 %456 }
  0xfc   :  { %392 = vmatmul.bf16.gmra.mxu3 %v569_v45 }
 0x10c   :  { %397 = vmatmul.bf16.gmra.mxu3 %v570_v54 }
 0x169   :  { %v383_v61 = vpop.f32.mrf.mxu1 }
 0x16a   :  { %v384_v6 = vadd.f32 %v383_v61, %v313_v55 }
 0x16c   :  { %v403_v10 = vmax.f32 %v384_v6, 0.0 }
 0x16e   :  { %v459_v17 = vmul.f32 %v422_v60, %v403_v10 }
 0x16f   :  { %v388_v58 = vpop.f32.mrf.mxu3 }
 0x170   :  { %v389_v11 = vadd.f32 %v388_v58, %v323_v57 }
 0x171   :  { %v385_v3 = vpop.f32.mrf.mxu1 }
 0x172   :  { %v386_v5 = vadd.f32 %v385_v3, %v318_v56  ;;  %v405_v18 = vmax.f32 %v389_v11, 0.0 }
 0x174   :  { %v404_v9 = vmax.f32 %v386_v5, 0.0  ;;  %v461_v26 = vmul.f32 %v432_v2, %v405_v18 }
 0x176   :  { %v460_v14 = vmul.f32 %v427_v63, %v404_v9 }
 0x177   :  { %v390_v62 = vpop.f32.mrf.mxu3 }
 0x178   :  { %v391_v12 = vadd.f32 %v390_v62, %v328_v59  ;;  %v467_v22 = vadd.f32 %v460_v14, %v459_v17 }
 0x17a   :  { %v406_v19 = vmax.f32 %v391_v12, 0.0  ;;  %v468_v29 = vadd.f32 %v467_v22, %v461_v26 }
 0x17c   :  { %v462_v27 = vmul.f32 %v437_v7, %v406_v19 }
 0x17e   :  { %v469_v33 = vadd.f32 %v468_v29, %v462_v27 }
 0x17f   :  { %v393_v1 = vpop.f32.mrf.mxu3 }
 0x180   :  { %v394_v15 = vadd.f32 %v393_v1, %v333_v0 }
 0x182   :  { %v407_v23 = vmax.f32 %v394_v15, 0.0 }
 0x184   :  { %v463_v30 = vmul.f32 %v442_v16, %v407_v23 }
 0x186   :  { %v470_v37 = vadd.f32 %v469_v33, %v463_v30 }
 0x187   :  { %v395_v8 = vpop.f32.mrf.mxu3 }
 0x188   :  { %v396_v20 = vadd.f32 %v395_v8, %v338_v4 }
 0x18a   :  { %v408_v28 = vmax.f32 %v396_v20, 0.0 }
 0x18c   :  { %v464_v34 = vmul.f32 %v447_v32, %v408_v28 }
 0x18e   :  { %v471_v40 = vadd.f32 %v470_v37, %v464_v34 }
 0x18f   :  { %v398_v21 = vpop.f32.mrf.mxu3 }
 0x190   :  { %v399_v24 = vadd.f32 %v398_v21, %v343_v13 }
 0x192   :  { %v409_v31 = vmax.f32 %v399_v24, 0.0 }
 0x194   :  { %v465_v38 = vmul.f32 %v452_v35, %v409_v31 }
 0x196   :  { %v472_v44 = vadd.f32 %v471_v40, %v465_v38 }
 0x197   :  { %v400_v36 = vpop.f32.mrf.mxu3 }
 0x198   :  { %v401_v39 = vadd.f32 %v400_v36, %v348_v25 }
 0x19a   :  { %v410_v41 = vmax.f32 %v401_v39, 0.0 }
 0x19c   :  { %v466_v46 = vmul.f32 %v457_v42, %v410_v41 }
 0x19e   :  { %v473_v48 = vadd.f32 %v472_v44, %v466_v46 }
 0x1a0   :  { %v474_v49 = vrot.slane %v473_v48, 4 }
 0x1a2   :  { %v475_v51 = vadd.f32 %v474_v49, %v473_v48 }
 0x1a4   :  { %v476_v52 = vrot.slane %v475_v51, 2 }
 0x1a6   :  { %v477_v47 = vadd.f32 %v476_v52, %v475_v51 }
 0x1a8   :  { %v478_v50 = vrot.slane %v477_v47, 1 }
 0x1aa   :  { %v479_v43 = vadd.f32 %v478_v50, %v477_v47 }
 0x1ac   :  { %v482_v45 = vadd.f32 %v481_v53, %v479_v43 }
 0x1ae   :  { %v483_v54 = vsub.f32 0.0, %v482_v45 }
 0x1b0   :  { %v484_v55 = vmul.f32 1.442695, %v483_v54 }
 0x1b2   :  { %585 = vpow2.f32 %v484_v55 }
 0x1b8   :  { %v586_v56 = vpop.eup %585 }
 0x1b9   :  { %v486_v57 = vadd.f32 1.0, %v586_v56 }
 0x1bb   :  { %587 = vrcp.f32 %v486_v57 }
 0x1c1   :  { %v588_v58 = vpop.eup %587 }
 0x1c2   :  { %488 = vst [vmem:[%s795_s7] sm:$0x1] %v588_v58 }

</bundles_post_ra>
